<compile_context>
chip_gen: v6e
topology: v6e:2x2x1
jax: 0.10.0
libtpu: 0.0.40
codegen_flags: <defaults>
</compile_context>

<pallas_src>
import functools

import jax
import jax.numpy as jnp
from jax.experimental import pallas as pl
from jax.experimental.pallas import tpu as pltpu


_DEFAULT_BLOCK_BYTES = 8 * 1024 * 1024   # ~8 MiB input blocks (16 MiB double-buffered)
_VMEM_LIMIT_BYTES = 32 * 1024 * 1024     # <= v7x 64 MiB physical; >> v5e 16 MiB scoped default
_MAX_LANE_CHUNKS = 32                    # bound on the unrolled per-lane accumulation loop


def _gap_kernel_whole_hw(x_ref, o_ref, *, inv_hw):
    """Whole-HW block per step. x_ref: (bc_tile, HW); o_ref: (1, bc_tile)."""
    s = jnp.sum(x_ref[...], axis=-1, dtype=jnp.float32)          # (bc_tile,)
    o_ref[...] = (s * inv_hw).astype(o_ref.dtype).reshape(o_ref.shape)


def _gap_kernel_tiled_hw(x_ref, o_ref, acc_ref, *, inv_hw, n_chunks):
    """HW tiled along grid axis 1. acc_ref: (bc_tile, 128) f32 per-lane partial sums."""
    hw_i = pl.program_id(1)

    @pl.when(hw_i == 0)
    def _():
        acc_ref[...] = jnp.zeros_like(acc_ref)

    x = x_ref[...]
    acc = acc_ref[...]
    # Lane-aligned static slices -> pure VPU adds; no per-step XLU reduce / relayout.
    for j in range(n_chunks):
        acc = acc + x[:, j * 128:(j + 1) * 128].astype(jnp.float32)
    acc_ref[...] = acc

    @pl.when(hw_i == pl.num_programs(1) - 1)
    def _():
        s = jnp.sum(acc_ref[...], axis=-1)                        # single 128->1 XLU reduce
        o_ref[...] = (s * inv_hw).astype(o_ref.dtype).reshape(o_ref.shape)


def _largest_aligned_divisor(n, align, cap):
    """Largest multiple of `align` that divides `n` and is <= cap, or None."""
    t = (min(cap, n) // align) * align
    while t >= align:
        if n % t == 0:
            return t
        t -= align
    return None


def _pick_tiles(bc, hw, itemsize, budget):
    """Choose (bc_tile, hw_tile, hw_padded) for the flattened (bc, hw) view."""
    # --- Case 1 (preferred): keep HW whole, tile the flattened B*C rows. ---
    rows_cap = budget // max(1, hw * itemsize)
    if bc % 128 == 0 and rows_cap >= 128:
        # Multiple-of-128 bc_tile satisfies the output lane constraint and every
        # dtype's sublane packing; prefer >=2 blocks so both v7x cores get work.
        cap = min(rows_cap, bc // 2) if bc >= 256 else rows_cap
        t = (_largest_aligned_divisor(bc, 128, cap)
             or _largest_aligned_divisor(bc, 128, rows_cap))
        if t is not None:
            return t, hw, hw
    if bc * hw * itemsize <= budget:
        return bc, hw, hw                    # full-dim block: always legal, small enough

    # --- Case 2: HW must be tiled along lanes (128 multiples; pad HW if needed). ---
    hw_padded = ((hw + 127) // 128) * 128
    bc_tile = 128 if bc % 128 == 0 else bc
    # TODO(synk): a huge B*C that is not a multiple of 128 still falls back to a full-BC
    # block here; a cdiv grid with a masked tail would be needed for that corner case.
    hw_cap = max(128, budget // max(1, bc_tile * itemsize))
    hw_cap = min(hw_cap, _MAX_LANE_CHUNKS * 128)
    hw_tile = _largest_aligned_divisor(hw_padded, 128, hw_cap) or 128
    if bc % 128 == 0:
        cap = budget // max(1, hw_tile * itemsize)
        if bc >= 256:
            cap = min(cap, bc // 2)          # keep >=2 parallel bc blocks when possible
        grown = _largest_aligned_divisor(bc, 128, max(128, cap))
        if grown is not None:
            bc_tile = grown
    return bc_tile, hw_tile, hw_padded


def global_avg_pool2d(x, *, target_block_bytes=_DEFAULT_BLOCK_BYTES):
    """Pallas TPU equivalent of F.avg_pool2d(x, kernel_size=x.size()[2:]) for NCHW x."""
    B, C, H, W = x.shape
    BC, HW = B * C, H * W
    itemsize = jnp.dtype(x.dtype).itemsize

    x2 = x.reshape(BC, HW)                   # free: NCHW is contiguous over (C, H, W)
    bc_tile, hw_tile, hw_padded = _pick_tiles(BC, HW, itemsize, target_block_bytes)
    if hw_padded != HW:
        # Zero-pad the reduction axis to a lane multiple; zeros don't change the sum
        # and we still divide by the true H*W.
        x2 = jnp.pad(x2, ((0, 0), (0, hw_padded - HW)))

    inv_hw = float(1.0 / HW)
    n_bc = BC // bc_tile
    n_hw = hw_padded // hw_tile

    cost = pl.CostEstimate(
        flops=BC * hw_padded,
        transcendentals=0,
        bytes_accessed=BC * hw_padded * itemsize + BC * itemsize,
    )

    if n_hw == 1:
        kernel = functools.partial(_gap_kernel_whole_hw, inv_hw=inv_hw)
        grid_spec = pltpu.PrefetchScalarGridSpec(
            num_scalar_prefetch=0,
            grid=(n_bc,),
            in_specs=[pl.BlockSpec((bc_tile, hw_padded), lambda i: (i, 0))],
            out_specs=pl.BlockSpec((1, bc_tile), lambda i: (0, i)),
        )
        dims = ("parallel",)
    else:
        kernel = functools.partial(
            _gap_kernel_tiled_hw, inv_hw=inv_hw, n_chunks=hw_tile // 128)
        grid_spec = pltpu.PrefetchScalarGridSpec(
            num_scalar_prefetch=0,
            grid=(n_bc, n_hw),
            in_specs=[pl.BlockSpec((bc_tile, hw_tile), lambda i, j: (i, j))],
            out_specs=pl.BlockSpec((1, bc_tile), lambda i, j: (0, i)),
            scratch_shapes=[pltpu.VMEM((bc_tile, 128), jnp.float32)],
        )
        dims = ("parallel", "arbitrary")

    out = pl.pallas_call(
        kernel,
        out_shape=jax.ShapeDtypeStruct((1, BC), x.dtype),
        grid_spec=grid_spec,
        compiler_params=pltpu.CompilerParams(
            dimension_semantics=dims,
            vmem_limit_bytes=_VMEM_LIMIT_BYTES,
        ),
        cost_estimate=cost,
    )(x2)

    return out.reshape(B, C, 1, 1)


if __name__ == "__main__":
    key = jax.random.PRNGKey(0)

    # Small shape matching the original module's toy test.
    B, C, H, W = 2, 4, 16, 16
    x = jax.random.normal(key, (B, C, H, W), dtype=jnp.float32)
    out = jax.block_until_ready(global_avg_pool2d(x))
    ref = jnp.mean(x, axis=(2, 3), keepdims=True)
    assert out.shape == (B, C, 1, 1), out.shape
    assert jnp.allclose(out, ref, atol=1e-5, rtol=1e-5)

    # Odd (non-aligned) spatial/channel dims: full-dim fallback block.
    xo = jax.random.normal(jax.random.PRNGKey(3), (2, 3, 7, 5), dtype=jnp.float32)
    outo = jax.block_until_ready(global_avg_pool2d(xo))
    refo = jnp.mean(xo, axis=(2, 3), keepdims=True)
    assert jnp.allclose(outo, refo, atol=1e-5, rtol=1e-5)

    # Larger shape: whole-HW blocks, flattened B*C tiled into >=2 parallel blocks.
    B2, C2, H2, W2 = 2, 512, 64, 64
    x2 = jax.random.normal(jax.random.PRNGKey(1), (B2, C2, H2, W2), dtype=jnp.float32)
    out2 = jax.block_until_ready(global_avg_pool2d(x2))
    ref2 = jnp.mean(x2, axis=(2, 3), keepdims=True)
    assert out2.shape == (B2, C2, 1, 1), out2.shape
    assert jnp.allclose(out2, ref2, atol=1e-4, rtol=1e-4)

    # bf16 input: f32 accumulation, multiple-of-128 tiling satisfies bf16 packing.
    xb = x2.astype(jnp.bfloat16)
    outb = jax.block_until_ready(global_avg_pool2d(xb))
    refb = jnp.mean(xb.astype(jnp.float32), axis=(2, 3), keepdims=True)
    assert jnp.allclose(outb.astype(jnp.float32), refb, atol=2e-2, rtol=2e-2)

    # Force the HW-tiled (deferred cross-lane reduce) path with a tiny block budget.
    out2b = jax.block_until_ready(global_avg_pool2d(x2, target_block_bytes=512 * 1024))
    assert jnp.allclose(out2b, ref2, atol=1e-4, rtol=1e-4)

    # Force the padded-HW + tiled path (HW not a multiple of 128).
    xp = jax.random.normal(jax.random.PRNGKey(2), (2, 256, 30, 30), dtype=jnp.float32)
    outp = jax.block_until_ready(global_avg_pool2d(xp, target_block_bytes=128 * 1024))
    refp = jnp.mean(xp, axis=(2, 3), keepdims=True)
    assert jnp.allclose(outp, refp, atol=1e-4, rtol=1e-4)

    print("KERNEL_OK")
</pallas_src>

<mosaic_0001>
module attributes {stable_mosaic.version = 11 : i64} {
  func.func @_gap_kernel_whole_hw(%arg0: i32, %arg1: memref<8x256xf32, #tpu.memory_space<vmem>>, %arg2: memref<1x8xf32, #tpu.memory_space<vmem>>) attributes {dimension_semantics = [#tpu.dimension_semantics<parallel>], iteration_bounds = array<i64: 1>, scalar_prefetch = 0 : i64, scratch_operands = 0 : i64, tpu.core_type = #tpu.core_type<tc>, window_params = [{transform_indices = @transform_0, window_bounds = array<i64: 8, 256>}, {transform_indices = @transform_1, window_bounds = array<i64: 1, 8>}]} {
    %c0 = arith.constant 0 : index
    %c0_0 = arith.constant 0 : index
    %0 = vector.load %arg1[%c0, %c0_0] : memref<8x256xf32, #tpu.memory_space<vmem>>, vector<8x256xf32>
    %cst = arith.constant dense<0.000000e+00> : vector<8xf32>
    %1 = vector.multi_reduction <add>, %0, %cst [1] : vector<8x256xf32> to vector<8xf32>
    %cst_1 = arith.constant 3.906250e-03 : f32
    %2 = vector.broadcast %cst_1 : f32 to vector<8xf32>
    %3 = arith.mulf %1, %2 : vector<8xf32>
    %4 = vector.shape_cast %3 : vector<8xf32> to vector<1x8xf32>
    %c0_2 = arith.constant 0 : index
    %c0_3 = arith.constant 0 : index
    %5 = vector.load %arg2[%c0_2, %c0_3] : memref<1x8xf32, #tpu.memory_space<vmem>>, vector<1x8xf32>
    tpu.vector_store %arg2[%c0_2, %c0_3], %4 {strides = array<i32>} : memref<1x8xf32, #tpu.memory_space<vmem>>, vector<1x8xf32>,
    return
  }
  func.func @transform_0(%arg0: i32) -> (i32, i32) {
    %c0_i32 = arith.constant 0 : i32
    %c0_i32_0 = arith.constant 0 : i32
    return %arg0, %c0_i32 : i32, i32
  }
  func.func @transform_1(%arg0: i32) -> (i32, i32) {
    %c0_i32 = arith.constant 0 : i32
    %c0_i32_0 = arith.constant 0 : i32
    return %c0_i32, %arg0 : i32, i32
  }
}

</mosaic_0001>

<bundles_post_ra>
// kernel: tpu_custom_call.1
= control target key start
LH: loop header
LB: loop body
LE: loop exit
PB: predicated region body
PF: predicated region fallthrough
CT: control target
= control target key end

     0   :  { %6 = vsyncpa [#allocation3], 0  ;;  %s116_s0 = inlined_call_operand.hbm [shape: f32[8,256], index: 0, kind: input, shape index: {}]   ;;  %s117_s1 = inlined_call_operand.hbm [shape: f32[1,8], index: 1, kind: output, shape index: {}]  }
   0x1   :  { %7 = vsyncpa [#allocation4], 0  ;;  %s98_s6 = smov [#allocation2]  }
   0x2   :  { %s14_s7 = sshll.u32 %s98_s6, 4  ;;  %s15_s7 = int_to_ptr.vmem [resolvable:$true] %s14_s7 }
   0x3   :  { %s62_s8 = scalar_lea.vmem %s15_s7, 256  ;;  %p67_p1 = scmp.lt.s32.totalorder %s15_s7, %s15_s7 }
   0x4   :  { %p63_p0 = scmp.ne.s32.totalorder %s15_s7, %s62_s8  ;;  %p68_p2 = scmp.lt.s32.totalorder %s62_s8, %s62_s8 }
   0x6   :  { %p69_p3 = por %p68_p2, %p67_p1 }
   0x8   :  { %p70_p4 = pnand %p69_p3, %p63_p0 }
   0xa   :  { %73 = shalt.err (!%p70_p4)
}
   0xb   :  { %17 = dma.hbm_to_vmem [thread:$0]  %s116_s0, 256, %s15_s7, [#allocation3]  }
   0xc   :  { %94 = dma.done.wait [#allocation3], 256  }
   0xd   :  { %95 = vsyncadd [#allocation3], 4294967040  ;;  %v21_v0 = vld [vmem:[#allocation2] sm:$0xff]  ;;  %v22_v1 = vld [vmem:[#allocation2 + $0x8] sm:$0xff]  ;;  %v28_v3 = vlaneseq  ;;  %s99_s11 = smov [#allocation5]   ;;  %vm35_vm0 = vcmask 57344  }
   0xe   :  { %v23_v2 = vadd.f32 %v22_v1, %v21_v0  ;;  %s43_s12 = sshll.u32 %s99_s11, 4  ;;  %s44_s12 = int_to_ptr.vmem [resolvable:$true] %s43_s12 }
   0xf   :  { %v29_v4 = vand.u32 127, %v28_v3  ;;  %v31_v5 = vshrl.u32 %v28_v3, 7  ;;  %s74_s13 = scalar_lea.vmem %s44_s12, 16  ;;  %s78_s0 = scalar_lea.vmem %s44_s12, 32 }
  0x10   :  { %24 = vadd.xlane.f32.xlu0 %v23_v2  ;;  %p75_p5 = scmp.ne.s32.totalorder %s44_s12, %s74_s13  ;;  %p79_p6 = scmp.lt.s32.totalorder %s44_s12, %s44_s12 }
  0x11   :  { %v32_v6 = vsub.s32 %v29_v4, %v31_v5  ;;  %p80_p7 = scmp.lt.s32.totalorder %s78_s0, %s74_s13 }
  0x13   :  { %p81_p8 = por %p80_p7, %p79_p6 }
  0x15   :  { %p82_p9 = pnand %p81_p8, %p75_p5 }
  0x99   :  { %v25_v7 = vpop.xlane.xlu0 %24 }
  0x9a   :  { %v26_v8 = vmul.f32 0.00390625, %v25_v7 }
  0x9c   :  { %v33_v9 = vrot.slane %v26_v8, %v32_v6 }
  0x9e   :  { %36 = vst.msk [vmem:[#allocation5] sm:$0x1] %vm35_vm0, %v33_v9 }
  0x9f   :  { %85 = shalt.err (!%p82_p9)
}
  0xa0   :  { %46 = dma.vmem_to_hbm [thread:$0]  %s44_s12, 16, %s117_s1, [#allocation4]  }
  0xa1   :  { %96 = dma.done.wait [#allocation4], 16  }
  0xa2   :  { %97 = vsyncadd [#allocation4], 4294967280 }
  0xa3   :  { %50 = vsyncpa [#allocation3], 1 }
  0xa4   :  { %51 = vsyncpa [#allocation4], 1 }

</bundles_post_ra>
